<compile_context>
chip_gen: v7x
topology: tpu7x:2x2x1
jax: 0.10.0
libtpu: 0.0.40
codegen_flags: <defaults>
</compile_context>

<pallas_src>
import functools
import math

import jax
import jax.numpy as jnp
from jax.experimental import pallas as pl
from jax.experimental.pallas import tpu as pltpu


def channel_attention_kernel(x_ref, w1t_ref, w2t_ref, o_ref, sum_ref, max_ref,
                             *, inv_l, l_total, block_l, need_mask):
    """Grid = (batch blocks, L blocks).  x block: (TB, C, TL); w1t: (C, H);
    w2t: (H, C); o block: (TB, C); scratch sum/max: (TB, C) f32."""
    l_idx = pl.program_id(1)

    @pl.when(l_idx == 0)
    def _():
        sum_ref[...] = jnp.zeros_like(sum_ref)
        max_ref[...] = jnp.full_like(max_ref, -jnp.inf)

    x = x_ref[...]                                        # (TB, C, TL), native dtype
    if need_mask:
        lane = jax.lax.broadcasted_iota(jnp.int32, x.shape, dimension=2)
        valid = (l_idx * block_l + lane) < l_total
        x_sum_in = jnp.where(valid, x, jnp.zeros((), x.dtype)).astype(jnp.float32)
        x_max_in = jnp.where(valid, x, jnp.asarray(-jnp.inf, x.dtype))
    else:
        x_sum_in = x.astype(jnp.float32)
        x_max_in = x

    # Pooling over this L block.  Bulk of the reduction is elementwise folds of
    # 128-lane chunks (VPU); only the final 128->1 reduce per row uses the XLU.
    tl = x.shape[-1]
    if tl % 128 == 0 and tl > 128:
        s_acc = x_sum_in[:, :, 0:128]
        m_acc = x_max_in[:, :, 0:128]
        for g in range(1, tl // 128):
            sl = slice(g * 128, (g + 1) * 128)
            s_acc = s_acc + x_sum_in[:, :, sl]
            m_acc = jnp.maximum(m_acc, x_max_in[:, :, sl])
    else:
        s_acc = x_sum_in
        m_acc = x_max_in

    sum_ref[...] += jnp.sum(s_acc, axis=-1)                         # (TB, C) f32
    max_ref[...] = jnp.maximum(max_ref[...],
                               jnp.max(m_acc, axis=-1).astype(jnp.float32))

    @pl.when(l_idx == pl.num_programs(1) - 1)
    def _():
        avg = sum_ref[...] * inv_l                                  # mean = sum * (1/L)
        mx = max_ref[...]
        # Fuse the two MLP branches into one matmul pair: stack along sublanes.
        pooled = jnp.concatenate([avg, mx], axis=0)                 # (2*TB, C) f32

        w1t = w1t_ref[...]                                          # (C, H)
        w2t = w2t_ref[...]                                          # (H, C)
        h = jnp.dot(pooled.astype(w1t.dtype), w1t,
                    preferred_element_type=jnp.float32)             # (2*TB, H)
        h = h * jax.nn.sigmoid(h)                                   # SiLU (EUP)
        y = jnp.dot(h.astype(w2t.dtype), w2t,
                    preferred_element_type=jnp.float32)             # (2*TB, C)

        tb = o_ref.shape[0]
        o_ref[...] = jax.nn.sigmoid(y[:tb] + y[tb:]).astype(o_ref.dtype)


def _round_up(n, m):
    return ((n + m - 1) // m) * m


def _vmem_budget_and_limit():
    """Per-generation sizing: ~1/4 of physical VMEM per (double-buffered) x
    tile and ~3/4 as the scoped limit.  128 MiB chips (v5e/v6e) -> 24/96 MiB;
    64 MiB (v7x) -> 16/48 MiB."""
    try:
        vmem = int(pltpu.get_tpu_info().vmem_capacity_bytes)
    except Exception:
        vmem = 64 * 1024 * 1024                       # conservative (v7x-sized)
    budget = min(24 * 1024 * 1024, vmem // 4)
    limit = min(96 * 1024 * 1024, (vmem // 4) * 3)
    return budget, limit


def _largest_divisor_block(total, cap):
    """Largest multiple-of-8 divisor of `total` (itself a multiple of 8) <= cap."""
    cap = max(8, min(cap, total))
    for cand in range((cap // 8) * 8, 7, -8):
        if total % cand == 0:
            return cand
    return 8


def _pick_blocks(B, C, L, itemsize, budget_bytes):
    """Choose (tb, b_pad, tl) accounting for the (8,128)-padded VMEM tile size."""
    c_pad = _round_up(C, 8)

    # --- L block ---
    if L <= 128 or 8 * c_pad * _round_up(L, 128) * itemsize <= budget_bytes:
        tl = L                                        # single L block
    else:
        max_tl = (budget_bytes // (8 * c_pad * itemsize)) // 128 * 128
        max_tl = max(128, max_tl)
        tl = None
        for t in range(max_tl, 127, -128):            # prefer a divisor of L
            if L % t == 0:
                tl = t
                break
        if tl is None:
            tl = max_tl                               # masked tail block
        if tl >= L:
            tl = L

    # --- batch block ---
    b_pad = _round_up(max(B, 8), 8)
    tile_cols = c_pad * _round_up(tl, 128) * itemsize
    max_tb = max(8, budget_bytes // tile_cols)
    tb_cap = max(8, min(1024, (max_tb // 8) * 8))
    if b_pad >= 16:
        tb_cap = min(tb_cap, b_pad // 2)              # keep >=2 parallel steps (v7x megacore)
    tb = _largest_divisor_block(b_pad, tb_cap)
    return tb, b_pad, tl


def channel_attention(x, w1, w2, *, block_b=None, block_l=None):
    """x: (B, C, L); w1: (C//ratio, C); w2: (C, C//ratio) -> (B, C, 1)."""
    B, C, L = x.shape
    H = w1.shape[0]
    itemsize = jnp.dtype(x.dtype).itemsize

    budget, vmem_limit = _vmem_budget_and_limit()
    tb, b_pad, tl = _pick_blocks(B, C, L, itemsize, budget)
    if block_l is not None:
        tl = block_l
    if block_b is not None:
        tb = block_b
        b_pad = _round_up(max(B, tb), tb)
    n_l = pl.cdiv(L, tl)
    need_mask = (L % tl) != 0

    # Pad the batch so every (tb, C) output block is fully valid (no silently
    # dropped rows, no masked stores).  Pad rows are sliced off below.
    xp = x if b_pad == B else jnp.pad(x, ((0, b_pad - B), (0, 0), (0, 0)))

    # Pre-transpose the tiny weight matrices once so the kernel runs plain
    # row-major matmuls: (2TB,C)@(C,H) then (2TB,H)@(H,C).
    w1t = jnp.transpose(w1)                           # (C, H)
    w2t = jnp.transpose(w2)                           # (H, C)

    kernel = functools.partial(
        channel_attention_kernel,
        inv_l=1.0 / L, l_total=L, block_l=tl, need_mask=need_mask)

    # TODO(synk): for L << 128 the last-axis lanes pad 16->128; a channels-last
    # (tb, L, C) or flat (tb, C*L) lane-dense layout with a segmented/sublane
    # reduction would cut VMEM + DMA traffic by up to 8x.
    out2d = pl.pallas_call(
        kernel,
        out_shape=jax.ShapeDtypeStruct((b_pad, C), x.dtype),
        grid_spec=pltpu.PrefetchScalarGridSpec(
            num_scalar_prefetch=0,
            grid=(b_pad // tb, n_l),
            in_specs=[
                pl.BlockSpec((tb, C, tl), lambda b, l: (b, 0, l)),
                pl.BlockSpec((C, H), lambda b, l: (0, 0)),
                pl.BlockSpec((H, C), lambda b, l: (0, 0)),
            ],
            out_specs=pl.BlockSpec((tb, C), lambda b, l: (b, 0)),
            scratch_shapes=[pltpu.VMEM((tb, C), jnp.float32),
                            pltpu.VMEM((tb, C), jnp.float32)],
        ),
        compiler_params=pltpu.CompilerParams(
            dimension_semantics=("parallel", "arbitrary"),
            vmem_limit_bytes=int(vmem_limit),
        ),
    )(xp, w1t, w2t)

    return out2d[:B, :, None]                          # (B, C, 1)


def channel_attention_ref(x, w1, w2):
    """Pure-JAX reference mirroring the PyTorch forward."""
    xf = x.astype(jnp.float32)
    avg = jnp.mean(xf, axis=-1, keepdims=True)         # (B, C, 1)
    mx = jnp.max(xf, axis=-1, keepdims=True)           # (B, C, 1)

    def mlp(v):
        h = jnp.einsum("hc,bcl->bhl", w1.astype(jnp.float32), v)
        h = h * jax.nn.sigmoid(h)
        return jnp.einsum("ch,bhl->bcl", w2.astype(jnp.float32), h)

    return jax.nn.sigmoid(mlp(avg) + mlp(mx)).astype(x.dtype)


if __name__ == "__main__":
    key = jax.random.PRNGKey(0)
    k_x, k_w1, k_w2, k_x2 = jax.random.split(key, 4)

    # Shapes consistent with the module: in_planes=64, ratio=16 -> hidden=4.
    B, C, L = 2, 64, 16
    ratio = 16
    H = C // ratio

    # Deterministic init (Kaiming-uniform-like bound, as PyTorch Conv1d default).
    bound1 = 1.0 / math.sqrt(C)
    bound2 = 1.0 / math.sqrt(H)
    w1 = jax.random.uniform(k_w1, (H, C), jnp.float32, -bound1, bound1)
    w2 = jax.random.uniform(k_w2, (C, H), jnp.float32, -bound2, bound2)

    # 1) Small single-L-block path (module's typical shape).
    x = jax.random.normal(k_x, (B, C, L), dtype=jnp.float32)
    out = jax.block_until_ready(channel_attention(x, w1, w2))
    ref = channel_attention_ref(x, w1, w2)
    assert out.shape == (B, C, 1)
    assert jnp.allclose(out, ref, atol=3e-5, rtol=3e-5)

    # 2) Multi-block L reduction path (VPU-folded pooling + masked tail block).
    L2 = 640
    x2 = jax.random.normal(k_x2, (B, C, L2), dtype=jnp.float32)
    out2 = jax.block_until_ready(channel_attention(x2, w1, w2, block_l=256))
    ref2 = channel_attention_ref(x2, w1, w2)
    assert out2.shape == (B, C, 1)
    assert jnp.allclose(out2, ref2, atol=3e-5, rtol=3e-5)

    print("KERNEL_OK")
</pallas_src>

<mosaic_0001>
module attributes {stable_mosaic.version = 11 : i64} {
  func.func @channel_attention_kernel(%arg0: i32, %arg1: i32, %arg2: memref<8x64x16xf32, #tpu.memory_space<vmem>>, %arg3: memref<64x4xf32, #tpu.memory_space<vmem>>, %arg4: memref<4x64xf32, #tpu.memory_space<vmem>>, %arg5: memref<8x64xf32, #tpu.memory_space<vmem>>, %arg6: memref<8x64xf32, #tpu.memory_space<vmem>>, %arg7: memref<8x64xf32, #tpu.memory_space<vmem>>) attributes {dimension_semantics = [#tpu.dimension_semantics<parallel>, #tpu.dimension_semantics<arbitrary>], iteration_bounds = array<i64: 1, 1>, scalar_prefetch = 0 : i64, scratch_operands = 2 : i64, tpu.core_type = #tpu.core_type<tc>, window_params = [{transform_indices = @transform_0, window_bounds = array<i64: 8, 64, 16>}, {pipeline_mode = #tpu.pipeline_mode<synchronous>, transform_indices = @transform_1, window_bounds = array<i64: 64, 4>}, {pipeline_mode = #tpu.pipeline_mode<synchronous>, transform_indices = @transform_2, window_bounds = array<i64: 4, 64>}, {transform_indices = @transform_3, window_bounds = array<i64: 8, 64>}]} {
    %c0_i32 = arith.constant 0 : i32
    %0 = arith.cmpi eq, %arg1, %c0_i32 : i32
    %1 = arith.extui %0 : i1 to i32
    %c0_i32_0 = arith.constant 0 : i32
    %2 = arith.cmpi ne, %1, %c0_i32_0 : i32
    scf.if %2 {
      %cst_14 = arith.constant 0.000000e+00 : f32
      %15 = vector.broadcast %cst_14 : f32 to vector<8x64xf32>
      %c0_15 = arith.constant 0 : index
      %c0_16 = arith.constant 0 : index
      %16 = vector.load %arg6[%c0_15, %c0_16] : memref<8x64xf32, #tpu.memory_space<vmem>>, vector<8x64xf32>
      tpu.vector_store %arg6[%c0_15, %c0_16], %15 {strides = array<i32>} : memref<8x64xf32, #tpu.memory_space<vmem>>, vector<8x64xf32>,
      %cst_17 = arith.constant 0xFF800000 : f32
      %17 = vector.broadcast %cst_17 : f32 to vector<8x64xf32>
      %c0_18 = arith.constant 0 : index
      %c0_19 = arith.constant 0 : index
      %18 = vector.load %arg7[%c0_18, %c0_19] : memref<8x64xf32, #tpu.memory_space<vmem>>, vector<8x64xf32>
      tpu.vector_store %arg7[%c0_18, %c0_19], %17 {strides = array<i32>} : memref<8x64xf32, #tpu.memory_space<vmem>>, vector<8x64xf32>,
    } else {
    }
    %c0 = arith.constant 0 : index
    %c0_1 = arith.constant 0 : index
    %c0_2 = arith.constant 0 : index
    %3 = vector.load %arg2[%c0, %c0_1, %c0_2] : memref<8x64x16xf32, #tpu.memory_space<vmem>>, vector<8x64x16xf32>
    %c0_3 = arith.constant 0 : index
    %c0_4 = arith.constant 0 : index
    %4 = vector.load %arg6[%c0_3, %c0_4] : memref<8x64xf32, #tpu.memory_space<vmem>>, vector<8x64xf32>
    %cst = arith.constant dense<0.000000e+00> : vector<8x64xf32>
    %5 = vector.multi_reduction <add>, %3, %cst [2] : vector<8x64x16xf32> to vector<8x64xf32>
    %6 = arith.addf %4, %5 : vector<8x64xf32>
    %c0_5 = arith.constant 0 : index
    %c0_6 = arith.constant 0 : index
    %7 = vector.load %arg6[%c0_5, %c0_6] : memref<8x64xf32, #tpu.memory_space<vmem>>, vector<8x64xf32>
    tpu.vector_store %arg6[%c0_5, %c0_6], %6 {strides = array<i32>} : memref<8x64xf32, #tpu.memory_space<vmem>>, vector<8x64xf32>,
    %c0_7 = arith.constant 0 : index
    %c0_8 = arith.constant 0 : index
    %8 = vector.load %arg7[%c0_7, %c0_8] : memref<8x64xf32, #tpu.memory_space<vmem>>, vector<8x64xf32>
    %cst_9 = arith.constant dense<0xFF800000> : vector<8x64xf32>
    %9 = vector.multi_reduction <maximumf>, %3, %cst_9 [2] : vector<8x64x16xf32> to vector<8x64xf32>
    %10 = arith.maximumf %8, %9 : vector<8x64xf32>
    %c0_10 = arith.constant 0 : index
    %c0_11 = arith.constant 0 : index
    %11 = vector.load %arg7[%c0_10, %c0_11] : memref<8x64xf32, #tpu.memory_space<vmem>>, vector<8x64xf32>
    tpu.vector_store %arg7[%c0_10, %c0_11], %10 {strides = array<i32>} : memref<8x64xf32, #tpu.memory_space<vmem>>, vector<8x64xf32>,
    %c0_i32_12 = arith.constant 0 : i32
    %12 = arith.cmpi eq, %arg1, %c0_i32_12 : i32
    %13 = arith.extui %12 : i1 to i32
    %c0_i32_13 = arith.constant 0 : i32
    %14 = arith.cmpi ne, %13, %c0_i32_13 : i32
    scf.if %14 {
      %c0_14 = arith.constant 0 : index
      %c0_15 = arith.constant 0 : index
      %15 = vector.load %arg6[%c0_14, %c0_15] : memref<8x64xf32, #tpu.memory_space<vmem>>, vector<8x64xf32>
      %cst_16 = arith.constant 6.250000e-02 : f32
      %16 = vector.broadcast %cst_16 : f32 to vector<8x64xf32>
      %17 = arith.mulf %15, %16 : vector<8x64xf32>
      %c0_17 = arith.constant 0 : index
      %c0_18 = arith.constant 0 : index
      %18 = vector.load %arg7[%c0_17, %c0_18] : memref<8x64xf32, #tpu.memory_space<vmem>>, vector<8x64xf32>
      %19 = tpu.concatenate %17, %18 in 0 : vector<8x64xf32>, vector<8x64xf32> -> vector<16x64xf32>
      %c0_19 = arith.constant 0 : index
      %c0_20 = arith.constant 0 : index
      %20 = vector.load %arg3[%c0_19, %c0_20] : memref<64x4xf32, #tpu.memory_space<vmem>>, vector<64x4xf32>
      %c0_21 = arith.constant 0 : index
      %c0_22 = arith.constant 0 : index
      %21 = vector.load %arg4[%c0_21, %c0_22] : memref<4x64xf32, #tpu.memory_space<vmem>>, vector<4x64xf32>
      %cst_23 = arith.constant dense<0.000000e+00> : vector<16x4xf32>
      %22 = tpu.matmul %19, %20, %cst_23 {dimension_numbers = #tpu.dot_dimension_numbers<[1], [0], [0], [1], [0, 0, 1, 1], [], []>} : vector<16x64xf32>, vector<64x4xf32>, vector<16x4xf32> -> vector<16x4xf32>
      %23 = arith.negf %22 : vector<16x4xf32>
      %24 = math.exp %23 : vector<16x4xf32>
      %cst_24 = arith.constant 1.000000e+00 : f32
      %25 = vector.broadcast %cst_24 : f32 to vector<16x4xf32>
      %26 = arith.addf %25, %24 : vector<16x4xf32>
      %27 = arith.divf %25, %26 : vector<16x4xf32>
      %28 = arith.mulf %22, %27 : vector<16x4xf32>
      %cst_25 = arith.constant dense<0.000000e+00> : vector<16x64xf32>
      %29 = tpu.matmul %28, %21, %cst_25 {dimension_numbers = #tpu.dot_dimension_numbers<[1], [0], [0], [1], [0, 0, 1, 1], [], []>} : vector<16x4xf32>, vector<4x64xf32>, vector<16x64xf32> -> vector<16x64xf32>
      %30 = vector.extract_strided_slice %29 {offsets = [0, 0], sizes = [8, 64], strides = [1, 1]} : vector<16x64xf32> to vector<8x64xf32>
      %31 = vector.extract_strided_slice %29 {offsets = [8, 0], sizes = [8, 64], strides = [1, 1]} : vector<16x64xf32> to vector<8x64xf32>
      %32 = arith.addf %30, %31 : vector<8x64xf32>
      %33 = arith.negf %32 : vector<8x64xf32>
      %34 = math.exp %33 : vector<8x64xf32>
      %cst_26 = arith.constant 1.000000e+00 : f32
      %35 = vector.broadcast %cst_26 : f32 to vector<8x64xf32>
      %36 = arith.addf %35, %34 : vector<8x64xf32>
      %37 = arith.divf %35, %36 : vector<8x64xf32>
      %c0_27 = arith.constant 0 : index
      %c0_28 = arith.constant 0 : index
      %38 = vector.load %arg5[%c0_27, %c0_28] : memref<8x64xf32, #tpu.memory_space<vmem>>, vector<8x64xf32>
      tpu.vector_store %arg5[%c0_27, %c0_28], %37 {strides = array<i32>} : memref<8x64xf32, #tpu.memory_space<vmem>>, vector<8x64xf32>,
    } else {
    }
    return
  }
  func.func @transform_0(%arg0: i32, %arg1: i32) -> (i32, i32, i32) {
    %c0_i32 = arith.constant 0 : i32
    %c0_i32_0 = arith.constant 0 : i32
    return %arg0, %c0_i32, %arg1 : i32, i32, i32
  }
  func.func @transform_1(%arg0: i32, %arg1: i32) -> (i32, i32) {
    %c0_i32 = arith.constant 0 : i32
    %c0_i32_0 = arith.constant 0 : i32
    %c0_i32_1 = arith.constant 0 : i32
    return %c0_i32, %c0_i32_0 : i32, i32
  }
  func.func @transform_2(%arg0: i32, %arg1: i32) -> (i32, i32) {
    %c0_i32 = arith.constant 0 : i32
    %c0_i32_0 = arith.constant 0 : i32
    %c0_i32_1 = arith.constant 0 : i32
    return %c0_i32, %c0_i32_0 : i32, i32
  }
  func.func @transform_3(%arg0: i32, %arg1: i32) -> (i32, i32) {
    %c0_i32 = arith.constant 0 : i32
    %c0_i32_0 = arith.constant 0 : i32
    return %arg0, %c0_i32 : i32, i32
  }
}

</mosaic_0001>

<bundles_post_ra>
// kernel: tpu_custom_call.1
= control target key start
LH: loop header
LB: loop body
LE: loop exit
PB: predicated region body
PF: predicated region fallthrough
CT: control target
= control target key end

     0   :  { %vm87_vm0 = vcmask 130048   ;;  %s2606_s0 = inlined_call_operand.vmem [shape: f32[8,64,16], index: 0, kind: input, shape index: {}]   ;;  %s2607_s1 = inlined_call_operand.vmem [shape: f32[64,4], index: 1, kind: input, shape index: {}]   ;;  %s2608_s2 = inlined_call_operand.vmem [shape: f32[4,64], index: 2, kind: input, shape index: {}]   ;;  %s2609_s3 = inlined_call_operand.hbm [shape: f32[8,64], index: 3, kind: output, shape index: {}]  }
   0x1   :  { %v30_v0 = vld [vmem:[%s2606_s0 + $0x40] sm:$0xff]  ;;  %v1619_v2 = vld [vmem:[%s2606_s0 + $0x48] sm:$0xff]  ;;  %v1632_v8 = vld [vmem:[%s2606_s0 + $0x50] sm:$0xff] }
   0x2   :  { %v22_v1 = vld [vmem:[%s2606_s0] sm:$0xff]  ;;  %v112_v3 = vsel %vm87_vm0, %v30_v0, 0.0  ;;  %v23_v5 = vld [vmem:[%s2606_s0 + $0x8] sm:$0xff]  ;;  %v115_v6 = vsel %vm87_vm0, %v1619_v2, 0.0  ;;  %v1637_v9 = vld [vmem:[%s2606_s0 + $0x10] sm:$0xff]  ;;  %v118_v10 = vsel %vm87_vm0, %v1632_v8, 0.0 }
   0x3   :  { %v88_v4 = vsel %vm87_vm0, %v22_v1, 0.0  ;;  %113 = vadd.xlane.f32.xlu1 %v112_v3  ;;  %v91_v7 = vsel %vm87_vm0, %v23_v5, 0.0  ;;  %v94_v11 = vsel %vm87_vm0, %v1637_v9, 0.0  ;;  %v1646_v12 = vld [vmem:[%s2606_s0 + $0x88] sm:$0xff]  ;;  %v1651_v13 = vld [vmem:[%s2606_s0 + $0x80] sm:$0xff]  ;;  %v1660_v16 = vld [vmem:[%s2606_s0 + $0x58] sm:$0xff] }
   0x4   :  { %89 = vadd.xlane.f32.xlu0 %v88_v4  ;;  %v139_v14 = vsel %vm87_vm0, %v1646_v12, 0.0  ;;  %v136_v15 = vsel %vm87_vm0, %v1651_v13, 0.0  ;;  %v1665_v17 = vld [vmem:[%s2606_s0 + $0x18] sm:$0xff]  ;;  %v121_v18 = vsel %vm87_vm0, %v1660_v16, 0.0  ;;  %v1674_v20 = vld [vmem:[%s2606_s0 + $0xc0] sm:$0xff]  ;;  %v1679_v21 = vld [vmem:[%s2606_s0 + $0x90] sm:$0xff] }
   0x5   :  { %v97_v19 = vsel %vm87_vm0, %v1665_v17, 0.0  ;;  %v160_v22 = vsel %vm87_vm0, %v1674_v20, 0.0  ;;  %v142_v23 = vsel %vm87_vm0, %v1679_v21, 0.0  ;;  %v1688_v24 = vld [vmem:[%s2606_s0 + $0x20] sm:$0xff]  ;;  %v1693_v25 = vld [vmem:[%s2606_s0 + $0xc8] sm:$0xff] }
   0x7   :  { %116 = vadd.xlane.f32.xlu1 %v115_v6 }
   0x8   :  { %92 = vadd.xlane.f32.xlu0 %v91_v7 }
   0xb   :  { %119 = vadd.xlane.f32.xlu1 %v118_v10 }
   0xc   :  { %95 = vadd.xlane.f32.xlu0 %v94_v11 }
   0xf   :  { %140 = vadd.xlane.f32.xlu1 %v139_v14 }
  0x10   :  { %137 = vadd.xlane.f32.xlu0 %v136_v15 }
  0x13   :  { %122 = vadd.xlane.f32.xlu1 %v121_v18 }
  0x14   :  { %98 = vadd.xlane.f32.xlu0 %v97_v19 }
  0x15   :  { %8 = vsyncpa [#allocation5], 0  ;;  %v100_v26 = vsel %vm87_vm0, %v1688_v24, 0.0  ;;  %v163_v27 = vsel %vm87_vm0, %v1693_v25, 0.0  ;;  %v1702_v28 = vld [vmem:[%s2606_s0 + $0x98] sm:$0xff]  ;;  %v1707_v29 = vld [vmem:[%s2606_s0 + $0x60] sm:$0xff] }
  0x16   :  { %v145_v30 = vsel %vm87_vm0, %v1702_v28, 0.0  ;;  %v124_v31 = vsel %vm87_vm0, %v1707_v29, 0.0  ;;  %v1716_v32 = vld [vmem:[%s2606_s0 + $0x100] sm:$0xff]  ;;  %v1721_v33 = vld [vmem:[%s2606_s0 + $0xd0] sm:$0xff]  ;;  %v1730_v36 = vld [vmem:[%s2606_s0 + $0x108] sm:$0xff]  ;;  %v691_v37 = vsel %vm87_vm0, %v22_v1, -inf }
  0x17   :  { %161 = vadd.xlane.f32.xlu1 %v160_v22  ;;  %v184_v34 = vsel %vm87_vm0, %v1716_v32, 0.0  ;;  %v166_v35 = vsel %vm87_vm0, %v1721_v33, 0.0  ;;  %v187_v38 = vsel %vm87_vm0, %v1730_v36, 0.0  ;;  %v715_v39 = vsel %vm87_vm0, %v30_v0, -inf  ;;  %v1740_v41 = vld [vmem:[%s2606_s0 + $0x28] sm:$0xff]  ;;  %v1749_v44 = vld [vmem:[%s2606_s0 + $0xa0] sm:$0xff] }
  0x18   :  { %143 = vadd.xlane.f32.xlu0 %v142_v23  ;;  %v694_v40 = vsel %vm87_vm0, %v23_v5, -inf  ;;  %v103_v42 = vsel %vm87_vm0, %v1740_v41, 0.0  ;;  %v718_v43 = vsel %vm87_vm0, %v1619_v2, -inf  ;;  %v1754_v45 = vld [vmem:[%s2606_s0 + $0x68] sm:$0xff]  ;;  %v148_v46 = vsel %vm87_vm0, %v1749_v44, 0.0  ;;  %v1763_v48 = vld [vmem:[%s2606_s0 + $0x110] sm:$0xff] }
  0x19   :  { %v127_v47 = vsel %vm87_vm0, %v1754_v45, 0.0  ;;  %v1768_v49 = vld [vmem:[%s2606_s0 + $0xd8] sm:$0xff]  ;;  %v190_v50 = vsel %vm87_vm0, %v1763_v48, 0.0  ;;  %v1777_v52 = vld [vmem:[%s2606_s0 + $0x148] sm:$0xff]  ;;  %v1782_v53 = vld [vmem:[%s2606_s0 + $0x140] sm:$0xff]  ;;  %v721_v56 = vsel %vm87_vm0, %v1632_v8, -inf }
  0x1a   :  { %v169_v51 = vsel %vm87_vm0, %v1768_v49, 0.0  ;;  %v211_v54 = vsel %vm87_vm0, %v1777_v52, 0.0  ;;  %v208_v55 = vsel %vm87_vm0, %v1782_v53, 0.0  ;;  %v697_v57 = vsel %vm87_vm0, %v1637_v9, -inf  ;;  %v1799_v60 = vld [vmem:[%s2606_s0 + $0x70] sm:$0xff]  ;;  %v1813_v0 = vld [vmem:[%s2606_s0 + $0xe0] sm:$0xff] }
  0x1b   :  { %101 = vadd.xlane.f32.xlu1 %v100_v26  ;;  %v742_v58 = vsel %vm87_vm0, %v1646_v12, -inf  ;;  %v739_v59 = vsel %vm87_vm0, %v1651_v13, -inf  ;;  %v1804_v61 = vld [vmem:[%s2606_s0 + $0x30] sm:$0xff]  ;;  %v130_v62 = vsel %vm87_vm0, %v1799_v60, 0.0  ;;  %v1818_v1 = vld [vmem:[%s2606_s0 + $0xa8] sm:$0xff]  ;;  %v172_v2 = vsel %vm87_vm0, %v1813_v0, 0.0 }
  0x1c   :  { %164 = vadd.xlane.f32.xlu0 %v163_v27  ;;  %v106_v63 = vsel %vm87_vm0, %v1804_v61, 0.0  ;;  %v151_v3 = vsel %vm87_vm0, %v1818_v1, 0.0  ;;  %v1827_v4 = vld [vmem:[%s2606_s0 + $0x150] sm:$0xff]  ;;  %v1832_v5 = vld [vmem:[%s2606_s0 + $0x118] sm:$0xff]  ;;  %v1841_v8 = vld [vmem:[%s2606_s0 + $0x188] sm:$0xff]  ;;  %v724_v12 = vsel %vm87_vm0, %v1660_v16, -inf }
  0x1d   :  { %v214_v6 = vsel %vm87_vm0, %v1827_v4, 0.0  ;;  %v193_v7 = vsel %vm87_vm0, %v1832_v5, 0.0  ;;  %v1846_v9 = vld [vmem:[%s2606_s0 + $0x180] sm:$0xff]  ;;  %v235_v10 = vsel %vm87_vm0, %v1841_v8, 0.0  ;;  %v700_v13 = vsel %vm87_vm0, %v1665_v17, -inf  ;;  %v1863_v18 = vld [vmem:[%s2606_s0 + $0x38] sm:$0xff] }
  0x1e   :  { %v232_v11 = vsel %vm87_vm0, %v1846_v9, 0.0  ;;  %v763_v14 = vsel %vm87_vm0, %v1674_v20, -inf  ;;  %v745_v15 = vsel %vm87_vm0, %v1679_v21, -inf  ;;  %v109_v16 = vsel %vm87_vm0, %v1863_v18, 0.0  ;;  %v1872_v19 = vld [vmem:[%s2606_s0 + $0xb0] sm:$0xff]  ;;  %v1877_v20 = vld [vmem:[%s2606_s0 + $0x78] sm:$0xff] }
  0x1f   :  { %146 = vadd.xlane.f32.xlu1 %v145_v30  ;;  %v766_v17 = vsel %vm87_vm0, %v1693_v25, -inf  ;;  %v154_v21 = vsel %vm87_vm0, %v1872_v19, 0.0  ;;  %v133_v22 = vsel %vm87_vm0, %v1877_v20, 0.0  ;;  %v1886_v23 = vld [vmem:[%s2606_s0 + $0x120] sm:$0xff]  ;;  %v1891_v25 = vld [vmem:[%s2606_s0 + $0xe8] sm:$0xff]  ;;  %v1900_v30 = vld [vmem:[%s2606_s0 + $0x190] sm:$0xff] }
  0x20   :  { %125 = vadd.xlane.f32.xlu0 %v124_v31  ;;  %v196_v26 = vsel %vm87_vm0, %v1886_v23, 0.0  ;;  %v175_v27 = vsel %vm87_vm0, %v1891_v25, 0.0  ;;  %v1905_v31 = vld [vmem:[%s2606_s0 + $0x158] sm:$0xff]  ;;  %vm355_vm1 = vcmask 130112   ;;  %vm362_vm2 = vcmask 195712  }
  0x21   :  { %vm369_vm3 = vcmask 261312   ;;  %vm376_vm4 = vcmask 326912   ;;  %vm383_vm5 = vcmask 392512   ;;  %vm390_vm6 = vcmask 458112  }
  0x22   :  { %vm397_vm7 = vcmask 523712   ;;  %vm672_vm8 = vcmask 1041409   ;;  %vm19_vm9 = vcmask 523264   ;;  %vm674_vm10 = vcmask 1042434  }
  0x23   :  { %185 = vadd.xlane.f32.xlu1 %v184_v34  ;;  %v238_v34 = vsel %vm87_vm0, %v1900_v30, 0.0  ;;  %vm676_vm11 = vcmask 1043459   ;;  %vm678_vm12 = vcmask 1044484   ;;  %vm680_vm13 = vcmask 1045509  }
  0x24   :  { %167 = vadd.xlane.f32.xlu0 %v166_v35  ;;  %v217_v35 = vsel %vm87_vm0, %v1905_v31, 0.0  ;;  %vm682_vm14 = vcmask 1046534   ;;  %vm684_vm15 = vcmask 1047559  }
  0x27   :  { %692 = vmax.xlane.f32.xlu1 %v691_v37  ;;  %v1914_v37 = vld [vmem:[%s2606_s0 + $0x1c8] sm:$0xff] }
  0x28   :  { %188 = vadd.xlane.f32.xlu0 %v187_v38  ;;  %v1919_v38 = vld [vmem:[%s2606_s0 + $0x1c0] sm:$0xff] }
  0x2b   :  { %716 = vmax.xlane.f32.xlu1 %v715_v39  ;;  %v259_v39 = vsel %vm87_vm0, %v1914_v37, 0.0 }
  0x2c   :  { %695 = vmax.xlane.f32.xlu0 %v694_v40  ;;  %v256_v40 = vsel %vm87_vm0, %v1919_v38, 0.0 }
  0x2f   :  { %104 = vadd.xlane.f32.xlu1 %v103_v42  ;;  %v727_v42 = vsel %vm87_vm0, %v1707_v29, -inf  ;;  %v1945_v29 = vld [vmem:[%s2606_s0 + $0xb8] sm:$0xff] }
  0x30   :  { %719 = vmax.xlane.f32.xlu0 %v718_v43  ;;  %v703_v43 = vsel %vm87_vm0, %v1688_v24, -inf  ;;  %v1940_v24 = vld [vmem:[%s2606_s0 + $0xf0] sm:$0xff] }
  0x33   :  { %149 = vadd.xlane.f32.xlu1 %v148_v46  ;;  %v769_v46 = vsel %vm87_vm0, %v1721_v33, -inf  ;;  %v157_v33 = vsel %vm87_vm0, %v1945_v29, 0.0 }
  0x34   :  { %128 = vadd.xlane.f32.xlu0 %v127_v47  ;;  %v748_v47 = vsel %vm87_vm0, %v1702_v28, -inf  ;;  %v178_v28 = vsel %vm87_vm0, %v1940_v24, 0.0 }
  0x37   :  { %191 = vadd.xlane.f32.xlu1 %v190_v50  ;;  %v790_v50 = vsel %vm87_vm0, %v1730_v36, -inf  ;;  %v1959_v36 = vld [vmem:[%s2606_s0 + $0x128] sm:$0xff] }
  0x38   :  { %170 = vadd.xlane.f32.xlu0 %v169_v51  ;;  %v787_v51 = vsel %vm87_vm0, %v1716_v32, -inf  ;;  %v1954_v32 = vld [vmem:[%s2606_s0 + $0x160] sm:$0xff] }
  0x3b   :  { %212 = vadd.xlane.f32.xlu1 %v211_v54  ;;  %v220_v54 = vsel %vm87_vm0, %v1954_v32, 0.0 }
  0x3c   :  { %209 = vadd.xlane.f32.xlu0 %v208_v55  ;;  %v199_v55 = vsel %vm87_vm0, %v1959_v36, 0.0 }
  0x3f   :  { %722 = vmax.xlane.f32.xlu1 %v721_v56  ;;  %v1968_v56 = vld [vmem:[%s2606_s0 + $0x1d0] sm:$0xff] }
  0x40   :  { %698 = vmax.xlane.f32.xlu0 %v697_v57  ;;  %v1973_v57 = vld [vmem:[%s2606_s0 + $0x198] sm:$0xff] }
  0x43   :  { %743 = vmax.xlane.f32.xlu1 %v742_v58  ;;  %v262_v58 = vsel %vm87_vm0, %v1968_v56, 0.0 }
  0x44   :  { %740 = vmax.xlane.f32.xlu0 %v739_v59  ;;  %v241_v59 = vsel %vm87_vm0, %v1973_v57, 0.0 }
  0x47   :  { %131 = vadd.xlane.f32.xlu1 %v130_v62  ;;  %v344_v62 = vlaneseq }
  0x48   :  { %107 = vadd.xlane.f32.xlu0 %v106_v63  ;;  %v730_v63 = vsel %vm87_vm0, %v1754_v45, -inf }
  0x4b   :  { %173 = vadd.xlane.f32.xlu1 %v172_v2  ;;  %v706_v2 = vsel %vm87_vm0, %v1740_v41, -inf  ;;  %v811_v41 = vsel %vm87_vm0, %v1782_v53, -inf }
  0x4c   :  { %152 = vadd.xlane.f32.xlu0 %v151_v3  ;;  %v1983_v3 = vand.u32 127, %v344_v62 }
  0x4f   :  { %215 = vadd.xlane.f32.xlu1 %v214_v6  ;;  %v772_v6 = vsel %vm87_vm0, %v1768_v49, -inf }
  0x50   :  { %194 = vadd.xlane.f32.xlu0 %v193_v7  ;;  %v751_v7 = vsel %vm87_vm0, %v1749_v44, -inf }
  0x53   :  { %236 = vadd.xlane.f32.xlu1 %v235_v10  ;;  %v1989_v10 = vshrl.u32 %v344_v62, 7 }
  0x54   :  { %233 = vadd.xlane.f32.xlu0 %v232_v11  ;;  %v350_v11 = vadd.s32 4294967288, %v1983_v3 }
  0x55   :  { %v1999_v49 = vsub.s32 %v1983_v3, %v1989_v10 }
  0x56   :  { %v2002_v44 = vsub.s32 %v350_v11, %v1989_v10 }
  0x57   :  { %725 = vmax.xlane.f32.xlu1 %v724_v12 }
  0x58   :  { %701 = vmax.xlane.f32.xlu0 %v700_v13  ;;  %v793_v13 = vsel %vm87_vm0, %v1763_v48, -inf }
  0x5b   :  { %764 = vmax.xlane.f32.xlu1 %v763_v14  ;;  %v357_v14 = vadd.s32 4294967280, %v1983_v3 }
  0x5c   :  { %746 = vmax.xlane.f32.xlu0 %v745_v15  ;;  %v2007_v15 = vld [vmem:[%s2606_s0 + $0xf8] sm:$0xff] }
  0x5d   :  { %v181_v48 = vsel %vm87_vm0, %v2007_v15, 0.0 }
  0x5f   :  { %110 = vadd.xlane.f32.xlu1 %v109_v16 }
  0x60   :  { %767 = vmax.xlane.f32.xlu0 %v766_v17  ;;  %v814_v17 = vsel %vm87_vm0, %v1777_v52, -inf  ;;  %v2028_v52 = vld [vmem:[%s2606_s0 + $0x130] sm:$0xff] }
  0x63   :  { %155 = vadd.xlane.f32.xlu1 %v154_v21  ;;  %v2014_v21 = vsub.s32 %v357_v14, %v1989_v10  ;;  %v709_v14 = vsel %vm87_vm0, %v1804_v61, -inf  ;;  %v754_v61 = vsel %vm87_vm0, %v1818_v1, -inf }
  0x64   :  { %134 = vadd.xlane.f32.xlu0 %v133_v22 }
  0x67   :  { %197 = vadd.xlane.f32.xlu1 %v196_v26 }
  0x68   :  { %176 = vadd.xlane.f32.xlu0 %v175_v27 }
  0x6b   :  { %239 = vadd.xlane.f32.xlu1 %v238_v34 }
  0x6c   :  { %218 = vadd.xlane.f32.xlu0 %v217_v35  ;;  %v2023_v35 = vld [vmem:[%s2606_s0 + $0x168] sm:$0xff] }
  0x6f   :  { %260 = vadd.xlane.f32.xlu1 %v259_v39 }
  0x70   :  { %257 = vadd.xlane.f32.xlu0 %v256_v40 }
  0x73   :  { %728 = vmax.xlane.f32.xlu1 %v727_v42 }
  0x74   :  { %704 = vmax.xlane.f32.xlu0 %v703_v43 }
  0x77   :  { %770 = vmax.xlane.f32.xlu1 %v769_v46  ;;  %v223_v46 = vsel %vm87_vm0, %v2023_v35, 0.0 }
  0x78   :  { %749 = vmax.xlane.f32.xlu0 %v748_v47  ;;  %v202_v47 = vsel %vm87_vm0, %v2028_v52, 0.0 }
  0x7b   :  { %791 = vmax.xlane.f32.xlu1 %v790_v50 }
  0x7c   :  { %788 = vmax.xlane.f32.xlu0 %v787_v51 }
  0x7f   :  { %179 = vadd.xlane.f32.xlu1 %v178_v28  ;;  %v2041_v28 = vld [vmem:[%s2606_s0 + $0x1d8] sm:$0xff] }
  0x80   :  { %158 = vadd.xlane.f32.xlu0 %v157_v33  ;;  %v2046_v33 = vld [vmem:[%s2606_s0 + $0x1a0] sm:$0xff] }
  0x83   :  { %221 = vadd.xlane.f32.xlu1 %v220_v54  ;;  %v364_v54 = vadd.s32 4294967272, %v1983_v3 }
  0x84   :  { %200 = vadd.xlane.f32.xlu0 %v199_v55 }
  0x85   :  { %v2058_v11 = vsub.s32 %v364_v54, %v1989_v10 }
  0x87   :  { %263 = vadd.xlane.f32.xlu1 %v262_v58 }
  0x88   :  { %242 = vadd.xlane.f32.xlu0 %v241_v59 }
  0x8b   :  { %731 = vmax.xlane.f32.xlu1 %v730_v63  ;;  %v265_v63 = vsel %vm87_vm0, %v2041_v28, 0.0 }
  0x8c   :  { %707 = vmax.xlane.f32.xlu0 %v706_v2  ;;  %v244_v2 = vsel %vm87_vm0, %v2046_v33, 0.0 }
  0x8f   :  { %773 = vmax.xlane.f32.xlu1 %v772_v6 }
  0x90   :  { %752 = vmax.xlane.f32.xlu0 %v751_v7  ;;  %v114_v45 = vpop.xlane.xlu1 %113 }
  0x91   :  { %v90_v12 = vpop.xlane.xlu0 %89  ;;  %v402_v22 = vrot.slane %v114_v45, %v1999_v49 }
  0x92   :  { %v349_v26 = vrot.slane %v90_v12, %v1999_v49 }
  0x93   :  { %812 = vmax.xlane.f32.xlu1 %v811_v41 }
  0x94   :  { %794 = vmax.xlane.f32.xlu0 %v793_v13  ;;  %v117_v53 = vpop.xlane.xlu1 %116  ;;  %v733_v13 = vsel %vm87_vm0, %v1799_v60, -inf  ;;  %v775_v60 = vsel %vm87_vm0, %v1813_v0, -inf  ;;  %v796_v0 = vsel %vm87_vm0, %v1832_v5, -inf  ;;  %v835_v5 = vsel %vm87_vm0, %v1846_v9, -inf }
  0x95   :  { %v93_v16 = vpop.xlane.xlu0 %92  ;;  %v406_v27 = vrot.slane %v117_v53, %v2002_v44 }
  0x96   :  { %v354_v34 = vrot.slane %v93_v16, %v2002_v44 }
  0x97   :  { %v407_v39 = vsel %vm355_vm1, %v406_v27, %v402_v22  ;;  %182 = vadd.xlane.f32.xlu1 %v181_v48  ;;  %v371_v48 = vadd.s32 4294967264, %v1983_v3 }
  0x98   :  { %v356_v40 = vsel %vm355_vm1, %v354_v34, %v349_v26  ;;  %815 = vmax.xlane.f32.xlu0 %v814_v17  ;;  %v120_v42 = vpop.xlane.xlu1 %119 }
  0x99   :  { %v96_v43 = vpop.xlane.xlu0 %95  ;;  %v411_v50 = vrot.slane %v120_v42, %v2014_v21 }
  0x9a   :  { %v361_v51 = vrot.slane %v96_v43, %v2014_v21 }
  0x9b   :  { %v412_v55 = vsel %vm362_vm2, %v411_v50, %v407_v39  ;;  %224 = vadd.xlane.f32.xlu1 %v223_v46  ;;  %v2076_v39 = vsub.s32 %v371_v48, %v1989_v10  ;;  %v817_v46 = vsel %vm87_vm0, %v1827_v4, -inf  ;;  %v838_v4 = vsel %vm87_vm0, %v1841_v8, -inf }
  0x9c   :  { %v363_v58 = vsel %vm362_vm2, %v361_v51, %v356_v40  ;;  %203 = vadd.xlane.f32.xlu0 %v202_v47  ;;  %v141_v59 = vpop.xlane.xlu1 %140 }
  0x9d   :  { %v138_v62 = vpop.xlane.xlu0 %137  ;;  %v445_v6 = vrot.slane %v141_v59, %v2002_v44 }
  0x9e   :  { %v441_v7 = vrot.slane %v138_v62, %v1999_v49 }
  0x9f   :  { %266 = vadd.xlane.f32.xlu1 %v265_v63  ;;  %v2097_v63 = vld [vmem:[%s2606_s0 + $0x170] sm:$0xff] }
  0xa0   :  { %v446_v45 = vsel %vm355_vm1, %v445_v6, %v441_v7  ;;  %245 = vadd.xlane.f32.xlu0 %v244_v2  ;;  %v123_v12 = vpop.xlane.xlu1 %122  ;;  %v2102_v2 = vld [vmem:[%s2606_s0 + $0x138] sm:$0xff] }
  0xa1   :  { %v99_v41 = vpop.xlane.xlu0 %98  ;;  %v416_v53 = vrot.slane %v123_v12, %v2058_v11  ;;  %v205_v12 = vsel %vm87_vm0, %v2102_v2, 0.0 }
  0xa2   :  { %v368_v16 = vrot.slane %v99_v41, %v2058_v11 }
  0xa3   :  { %v417_v17 = vsel %vm369_vm3, %v416_v53, %v412_v55  ;;  %734 = vmax.xlane.f32.xlu1 %v733_v13  ;;  %v2114_v13 = vld [vmem:[%s2606_s0 + $0x1e0] sm:$0xff] }
  0xa4   :  { %v370_v22 = vsel %vm369_vm3, %v368_v16, %v363_v58  ;;  %710 = vmax.xlane.f32.xlu0 %v709_v14  ;;  %v162_v26 = vpop.xlane.xlu1 %161  ;;  %v2119_v14 = vld [vmem:[%s2606_s0 + $0x1a8] sm:$0xff] }
  0xa5   :  { %v144_v27 = vpop.xlane.xlu0 %143  ;;  %v480_v1 = vrot.slane %v162_v26, %v1999_v49 }
  0xa6   :  { %v450_v34 = vrot.slane %v144_v27, %v2014_v21 }
  0xa7   :  { %776 = vmax.xlane.f32.xlu1 %v775_v60  ;;  %v378_v60 = vadd.s32 4294967256, %v1983_v3 }
  0xa8   :  { %v451_v40 = vsel %vm362_vm2, %v450_v34, %v446_v45  ;;  %755 = vmax.xlane.f32.xlu0 %v754_v61  ;;  %v102_v42 = vpop.xlane.xlu1 %101  ;;  %v226_v45 = vsel %vm87_vm0, %v2097_v63, 0.0 }
  0xa9   :  { %v165_v43 = vpop.xlane.xlu0 %164  ;;  %v375_v47 = vrot.slane %v102_v42, %v2076_v39  ;;  %v736_v42 = vsel %vm87_vm0, %v1877_v20, -inf  ;;  %v778_v20 = vsel %vm87_vm0, %v1891_v25, -inf  ;;  %v820_v25 = vsel %vm87_vm0, %v1905_v31, -inf }
  0xaa   :  { %v484_v50 = vrot.slane %v165_v43, %v2002_v44  ;;  %v712_v43 = vsel %vm87_vm0, %v1863_v18, -inf  ;;  %v757_v18 = vsel %vm87_vm0, %v1872_v19, -inf  ;;  %v799_v19 = vsel %vm87_vm0, %v1886_v23, -inf }
  0xab   :  { %v377_v51 = vsel %vm376_vm4, %v375_v47, %v370_v22  ;;  %818 = vmax.xlane.f32.xlu1 %v817_v46  ;;  %v247_v22 = vsel %vm87_vm0, %v2119_v14, 0.0  ;;  %v841_v31 = vsel %vm87_vm0, %v1900_v30, -inf }
  0xac   :  { %v485_v54 = vsel %vm355_vm1, %v484_v50, %v480_v1  ;;  %797 = vmax.xlane.f32.xlu0 %v796_v0  ;;  %v147_v55 = vpop.xlane.xlu1 %146  ;;  %v2137_v1 = vsub.s32 %v378_v60, %v1989_v10 }
  0xad   :  { %v126_v58 = vpop.xlane.xlu0 %125  ;;  %v455_v59 = vrot.slane %v147_v55, %v2058_v11 }
  0xae   :  { %v421_v62 = vrot.slane %v126_v58, %v2076_v39 }
  0xaf   :  { %v456_v6 = vsel %vm369_vm3, %v455_v59, %v451_v40  ;;  %839 = vmax.xlane.f32.xlu1 %v838_v4 }
  0xb0   :  { %v422_v8 = vsel %vm376_vm4, %v421_v62, %v417_v17  ;;  %836 = vmax.xlane.f32.xlu0 %v835_v5  ;;  %v186_v9 = vpop.xlane.xlu1 %185  ;;  %v268_v17 = vsel %vm87_vm0, %v2114_v13, 0.0 }
  0xb1   :  { %v168_v7 = vpop.xlane.xlu0 %167  ;;  %v519_v26 = vrot.slane %v186_v9, %v1999_v49 }
  0xb2   :  { %v489_v41 = vrot.slane %v168_v7, %v2014_v21 }
  0xb3   :  { %227 = vadd.xlane.f32.xlu1 %v226_v45 }
  0xb4   :  { %v490_v53 = vsel %vm362_vm2, %v489_v41, %v485_v54  ;;  %206 = vadd.xlane.f32.xlu0 %v205_v12  ;;  %v693_v16 = vpop.xlane.xlu1 %692 }
  0xb5   :  { %v189_v48 = vpop.xlane.xlu0 %188  ;;  %v950_v46 = vrot.slane %v693_v16, %v1999_v49 }
  0xb6   :  { %v523_v27 = vrot.slane %v189_v48, %v2002_v44  ;;  %v859_v48 = vsel %vm87_vm0, %v1919_v38, -inf }
  0xb7   :  { %269 = vadd.xlane.f32.xlu1 %v268_v17 }
  0xb8   :  { %v524_v61 = vsel %vm355_vm1, %v523_v27, %v519_v26  ;;  %248 = vadd.xlane.f32.xlu0 %v247_v22  ;;  %v717_v34 = vpop.xlane.xlu1 %716  ;;  %v862_v27 = vsel %vm87_vm0, %v1914_v37, -inf }
  0xb9   :  { %v696_v40 = vpop.xlane.xlu0 %695  ;;  %v989_v55 = vrot.slane %v717_v34, %v1999_v49 }
  0xba   :  { %v954_v0 = vrot.slane %v696_v40, %v2002_v44 }
  0xbb   :  { %737 = vmax.xlane.f32.xlu1 %v736_v42 }
  0xbc   :  { %v955_v47 = vsel %vm355_vm1, %v954_v0, %v950_v46  ;;  %713 = vmax.xlane.f32.xlu0 %v712_v43  ;;  %v105_v50 = vpop.xlane.xlu1 %104 }
  0xbd   :  { %v720_v54 = vpop.xlane.xlu0 %719  ;;  %v382_v58 = vrot.slane %v105_v50, %v2137_v1 }
  0xbe   :  { %v993_v4 = vrot.slane %v720_v54, %v2002_v44  ;;  %v385_v54 = vadd.s32 4294967248, %v1983_v3 }
  0xbf   :  { %v2148_v5 = vsel %vm383_vm5, %v382_v58, %v377_v51  ;;  %779 = vmax.xlane.f32.xlu1 %v778_v20 }
  0xc0   :  { %v994_v59 = vsel %vm355_vm1, %v993_v4, %v989_v55  ;;  %758 = vmax.xlane.f32.xlu0 %v757_v18  ;;  %v150_v62 = vpop.xlane.xlu1 %149  ;;  %v781_v4 = vsel %vm87_vm0, %v1940_v24, -inf  ;;  %v823_v24 = vsel %vm87_vm0, %v1954_v32, -inf  ;;  %v865_v32 = vsel %vm87_vm0, %v1968_v56, -inf }
  0xc1   :  { %v129_v9 = vpop.xlane.xlu0 %128  ;;  %v460_v7 = vrot.slane %v150_v62, %v2076_v39  ;;  %v760_v62 = vsel %vm87_vm0, %v1945_v29, -inf  ;;  %v802_v29 = vsel %vm87_vm0, %v1959_v36, -inf  ;;  %v844_v36 = vsel %vm87_vm0, %v1973_v57, -inf }
  0xc2   :  { %v426_v45 = vrot.slane %v129_v9, %v2137_v1 }
  0xc3   :  { %v2158_v12 = vsel %vm376_vm4, %v460_v7, %v456_v6  ;;  %821 = vmax.xlane.f32.xlu1 %v820_v25  ;;  %v2170_v6 = vld [vmem:[%s2606_s0 + $0x178] sm:$0xff] }
  0xc4   :  { %v427_v51 = vsel %vm383_vm5, %v426_v45, %v422_v8  ;;  %800 = vmax.xlane.f32.xlu0 %v799_v19  ;;  %v192_v41 = vpop.xlane.xlu1 %191  ;;  %v229_v30 = vsel %vm87_vm0, %v2170_v6, 0.0 }
  0xc5   :  { %v171_v16 = vpop.xlane.xlu0 %170  ;;  %v528_v23 = vrot.slane %v192_v41, %v2014_v21 }
  0xc6   :  { %v494_v17 = vrot.slane %v171_v16, %v2058_v11 }
  0xc7   :  { %v2173_v8 = vsel %vm362_vm2, %v528_v23, %v524_v61  ;;  %860 = vmax.xlane.f32.xlu1 %v859_v48  ;;  %v2185_v61 = vld [vmem:[%s2606_s0 + $0x1e8] sm:$0xff] }
  0xc8   :  { %v495_v22 = vsel %vm369_vm3, %v494_v17, %v490_v53  ;;  %842 = vmax.xlane.f32.xlu0 %v841_v31  ;;  %v213_v38 = vpop.xlane.xlu1 %212  ;;  %v2190_v53 = vld [vmem:[%s2606_s0 + $0x1b0] sm:$0xff]  ;;  %v271_v43 = vsel %vm87_vm0, %v2185_v61, 0.0 }
  0xc9   :  { %v210_v26 = vpop.xlane.xlu0 %209  ;;  %v562_v60 = vrot.slane %v213_v38, %v2002_v44  ;;  %v250_v46 = vsel %vm87_vm0, %v2190_v53, 0.0 }
  0xca   :  { %v558_v34 = vrot.slane %v210_v26, %v1999_v49 }
  0xcb   :  { %230 = vadd.xlane.f32.xlu1 %v229_v30 }
  0xcc   :  { %v563_v40 = vsel %vm355_vm1, %v562_v60, %v558_v34  ;;  %863 = vmax.xlane.f32.xlu0 %v862_v27  ;;  %v723_v42 = vpop.xlane.xlu1 %722 }
  0xcd   :  { %v699_v37 = vpop.xlane.xlu0 %698  ;;  %v998_v0 = vrot.slane %v723_v42, %v2014_v21 }
  0xce   :  { %v959_v50 = vrot.slane %v699_v37, %v2014_v21 }
  0xcf   :  { %v2201_v20 = vsel %vm362_vm2, %v998_v0, %v994_v59  ;;  %272 = vadd.xlane.f32.xlu1 %v271_v43  ;;  %v2213_v59 = vsub.s32 %v385_v54, %v1989_v10  ;;  %v784_v0 = vsel %vm87_vm0, %v2007_v15, -inf }
  0xd0   :  { %v2204_v18 = vsel %vm362_vm2, %v959_v50, %v955_v47  ;;  %251 = vadd.xlane.f32.xlu0 %v250_v46  ;;  %v744_v55 = vpop.xlane.xlu1 %743  ;;  %v805_v46 = vsel %vm87_vm0, %v2028_v52, -inf  ;;  %v826_v52 = vsel %vm87_vm0, %v2023_v35, -inf }
  0xd1   :  { %v741_v58 = vpop.xlane.xlu0 %740  ;;  %v1032_v9 = vrot.slane %v744_v55, %v2002_v44 }
  0xd2   :  { %v1028_v25 = vrot.slane %v741_v58, %v1999_v49  ;;  %v847_v58 = vsel %vm87_vm0, %v2046_v33, -inf }
  0xd3   :  { %782 = vmax.xlane.f32.xlu1 %v781_v4 }
  0xd4   :  { %v2216_v47 = vsel %vm355_vm1, %v1032_v9, %v1028_v25  ;;  %761 = vmax.xlane.f32.xlu0 %v760_v62  ;;  %v132_v19 = vpop.xlane.xlu1 %131  ;;  %v2285_v62 = vld [vmem:[%s2606_s0 + $0x1f8] sm:$0xff]  ;;  %v392_v9 = vadd.s32 4294967240, %v1983_v3 }
  0xd5   :  { %v108_v7 = vpop.xlane.xlu0 %107  ;;  %v431_v45 = vrot.slane %v132_v19, %v2213_v59 }
  0xd6   :  { %v389_v41 = vrot.slane %v108_v7, %v2213_v59  ;;  %v277_v7 = vsel %vm87_vm0, %v2285_v62, 0.0 }
  0xd7   :  { %v2225_v16 = vsel %vm390_vm6, %v431_v45, %v427_v51  ;;  %824 = vmax.xlane.f32.xlu1 %v823_v24  ;;  %v2240_v51 = vld [vmem:[%s2606_s0 + $0x1f0] sm:$0xff]  ;;  %v868_v24 = vsel %vm87_vm0, %v2041_v28, -inf  ;;  %v808_v28 = vsel %vm87_vm0, %v2102_v2, -inf  ;;  %v850_v2 = vsel %vm87_vm0, %v2119_v14, -inf }
  0xd8   :  { %v2229_v48 = vsel %vm390_vm6, %v389_v41, %v2148_v5  ;;  %803 = vmax.xlane.f32.xlu0 %v802_v29  ;;  %v174_v31 = vpop.xlane.xlu1 %173  ;;  %v2245_v5 = vld [vmem:[%s2606_s0 + $0x1b8] sm:$0xff]  ;;  %v274_v27 = vsel %vm87_vm0, %v2240_v51, 0.0  ;;  %v2302_v29 = vsub.s32 %v392_v9, %v1989_v10  ;;  %v829_v41 = vsel %vm87_vm0, %v2097_v63, -inf }
  0xd9   :  { %v153_v23 = vpop.xlane.xlu0 %152  ;;  %v499_v17 = vrot.slane %v174_v31, %v2076_v39  ;;  %v253_v60 = vsel %vm87_vm0, %v2245_v5, 0.0  ;;  %v871_v63 = vsel %vm87_vm0, %v2114_v13, -inf  ;;  %v853_v13 = vsel %vm87_vm0, %v2190_v53, -inf }
  0xda   :  { %v465_v38 = vrot.slane %v153_v23, %v2137_v1 }
  0xdb   :  { %v2248_v26 = vsel %vm376_vm4, %v499_v17, %v495_v22  ;;  %866 = vmax.xlane.f32.xlu1 %v865_v32 }
  0xdc   :  { %v2252_v56 = vsel %vm383_vm5, %v465_v38, %v2158_v12  ;;  %845 = vmax.xlane.f32.xlu0 %v844_v36  ;;  %v216_v57 = vpop.xlane.xlu1 %215 }
  0xdd   :  { %v195_v30 = vpop.xlane.xlu0 %194  ;;  %v567_v34 = vrot.slane %v216_v57, %v2014_v21 }
  0xde   :  { %v533_v42 = vrot.slane %v195_v30, %v2058_v11 }
  0xdf   :  { %v2261_v22 = vsel %vm362_vm2, %v567_v34, %v563_v40  ;;  %275 = vadd.xlane.f32.xlu1 %v274_v27  ;;  %v832_v34 = vsel %vm87_vm0, %v2170_v6, -inf  ;;  %v856_v6 = vsel %vm87_vm0, %v2245_v5, -inf  ;;  %v877_v5 = vsel %vm87_vm0, %v2240_v51, -inf }
  0xe0   :  { %v2265_v12 = vsel %vm369_vm3, %v533_v42, %v2173_v8  ;;  %254 = vadd.xlane.f32.xlu0 %v253_v60  ;;  %v237_v37 = vpop.xlane.xlu1 %236 }
  0xe1   :  { %v234_v43 = vpop.xlane.xlu0 %233  ;;  %v601_v50 = vrot.slane %v237_v37, %v2002_v44  ;;  %v1587_v37 = vmov 0.0  }
  0xe2   :  { %v597_v54 = vrot.slane %v234_v43, %v1999_v49  ;;  %20 = vst.msk [vmem:[#allocation2] sm:$0xff] %vm19_vm9, %v1587_v37  ;;  %v1280_v37 = vld [vmem:[%s2607_s1 + $0x28] sm:$0xff] }
  0xe3   :  { %806 = vmax.xlane.f32.xlu1 %v805_v46 }
  0xe4   :  { %v2274_v40 = vsel %vm355_vm1, %v601_v50, %v597_v54  ;;  %785 = vmax.xlane.f32.xlu0 %v784_v0  ;;  %v726_v8 = vpop.xlane.xlu1 %725  ;;  %v874_v0 = vsel %vm87_vm0, %v2185_v61, -inf  ;;  %v880_v61 = vsel %vm87_vm0, %v2285_v62, -inf  ;;  %vm1386_vm0 = vcmask 1043456  }
  0xe5   :  { %v702_v55 = vpop.xlane.xlu0 %701  ;;  %v1003_v4 = vrot.slane %v726_v8, %v2058_v11 }
  0xe6   :  { %v964_v15 = vrot.slane %v702_v55, %v2058_v11 }
  0xe7   :  { %v2290_v25 = vsel %vm369_vm3, %v1003_v4, %v2201_v20  ;;  %848 = vmax.xlane.f32.xlu1 %v847_v58 }
  0xe8   :  { %v2294_v33 = vsel %vm369_vm3, %v964_v15, %v2204_v18  ;;  %827 = vmax.xlane.f32.xlu0 %v826_v52  ;;  %v765_v35 = vpop.xlane.xlu1 %764 }
  0xe9   :  { %v747_v19 = vpop.xlane.xlu0 %746  ;;  %v1067_v31 = vrot.slane %v765_v35, %v1999_v49 }
  0xea   :  { %v1037_v3 = vrot.slane %v747_v19, %v2014_v21 }
  0xeb   :  { %278 = vadd.xlane.f32.xlu1 %v277_v7 }
  0xec   :  { %v2306_v20 = vsel %vm362_vm2, %v1037_v3, %v2216_v47  ;;  %869 = vmax.xlane.f32.xlu0 %v868_v24  ;;  %v111_v18 = vpop.xlane.xlu1 %110 }
  0xed   :  { %v768_v45 = vpop.xlane.xlu0 %767  ;;  %v396_v10 = vrot.slane %v111_v18, %v2302_v29 }
  0xee   :  { %v1071_v23 = vrot.slane %v768_v45, %v2002_v44 }
  0xef   :  { %v398_v47 = vsel %vm397_vm7, %v396_v10, %v2229_v48  ;;  %830 = vmax.xlane.f32.xlu1 %v829_v41 }
  0xf0   :  { %v1072_v32 = vsel %vm355_vm1, %v1071_v23, %v1067_v31  ;;  %809 = vmax.xlane.f32.xlu0 %v808_v28  ;;  %v156_v36 = vpop.xlane.xlu1 %155  ;;  %v1276_v31 = vld [vmem:[%s2607_s1 + $0x8] sm:$0xff]  ;;  %v1588_v23 = vmov -inf  }
  0xf1   :  { %v135_v17 = vpop.xlane.xlu0 %134  ;;  %v470_v38 = vrot.slane %v156_v36, %v2213_v59  ;;  %21 = vst.msk [vmem:[#allocation3] sm:$0xff] %vm19_vm9, %v1588_v23 }
  0xf2   :  { %v436_v57 = vrot.slane %v135_v17, %v2302_v29 }
  0xf3   :  { %v2326_v48 = vsel %vm390_vm6, %v470_v38, %v2252_v56  ;;  %872 = vmax.xlane.f32.xlu1 %v871_v63  ;;  %v1277_v63 = vld [vmem:[%s2607_s1 + $0x10] sm:$0xff] }
  0xf4   :  { %v437_v30 = vsel %vm397_vm7, %v436_v57, %v2225_v16  ;;  %851 = vmax.xlane.f32.xlu0 %v850_v2  ;;  %v198_v14 = vpop.xlane.xlu1 %197  ;;  %v1278_v2 = vld [vmem:[%s2607_s1 + $0x18] sm:$0xff] }
  0xf5   :  { %v2333_v27 = vsel %vm672_vm8, %v437_v30, %v398_v47  ;;  %v177_v60 = vpop.xlane.xlu0 %176  ;;  %v538_v56 = vrot.slane %v198_v14, %v2076_v39  ;;  %v1536_v38 = vpack.c.bf16 %v1278_v2, %v1277_v63 }
  0xf6   :  { %v504_v42 = vrot.slane %v177_v60, %v2137_v1 }
  0xf7   :  { %v2342_v16 = vsel %vm376_vm4, %v538_v56, %v2265_v12  ;;  %854 = vmax.xlane.f32.xlu1 %v853_v13 }
  0xf8   :  { %v505_v53 = vsel %vm383_vm5, %v504_v42, %v2248_v26  ;;  %833 = vmax.xlane.f32.xlu0 %v832_v34  ;;  %v240_v43 = vpop.xlane.xlu1 %239  ;;  %v1279_v42 = vld [vmem:[%s2607_s1 + $0x20] sm:$0xff] }
  0xf9   :  { %v219_v46 = vpop.xlane.xlu0 %218  ;;  %v606_v50 = vrot.slane %v240_v43, %v2014_v21 }
  0xfa   :  { %v572_v54 = vrot.slane %v219_v46, %v2058_v11 }
  0xfb   :  { %v2354_v12 = vsel %vm362_vm2, %v606_v50, %v2274_v40  ;;  %857 = vmax.xlane.f32.xlu1 %v856_v6  ;;  %v1281_v6 = vld [vmem:[%s2607_s1 + $0x30] sm:$0xff] }
  0xfc   :  { %v573_v26 = vsel %vm369_vm3, %v572_v54, %v2261_v22  ;;  %875 = vmax.xlane.f32.xlu0 %v874_v0  ;;  %v261_v8 = vpop.xlane.xlu1 %260  ;;  %v1282_v0 = vld [vmem:[%s2607_s1 + $0x38] sm:$0xff] }
  0xfd   :  { %v258_v55 = vpop.xlane.xlu0 %257  ;;  %v640_v58 = vrot.slane %v261_v8, %v2002_v44 }
  0xfe   :  { %v636_v52 = vrot.slane %v258_v55, %v1999_v49 }
  0xff   :  { %881 = vmax.xlane.f32.xlu1 %v880_v61 }
 0x100   :  { %v641_v40 = vsel %vm355_vm1, %v640_v58, %v636_v52  ;;  %878 = vmax.xlane.f32.xlu0 %v877_v5  ;;  %v729_v4 = vpop.xlane.xlu1 %728 }
 0x101   :  { %v705_v22 = vpop.xlane.xlu0 %704  ;;  %v1008_v15 = vrot.slane %v729_v4, %v2076_v39 }
 0x102   :  { %v969_v9 = vrot.slane %v705_v22, %v2076_v39 }
 0x103   :  { %v1009_v51 = vsel %vm376_vm4, %v1008_v15, %v2290_v25 }
 0x104   :  { %v970_v62 = vsel %vm376_vm4, %v969_v9, %v2294_v33  ;;  %v771_v35 = vpop.xlane.xlu1 %770  ;;  %v1275_v33 = vld [vmem:[%s2607_s1] sm:$0xff] }
 0x105   :  { %v750_v19 = vpop.xlane.xlu0 %749  ;;  %v1076_v7 = vrot.slane %v771_v35, %v2014_v21  ;;  %v1532_v10 = vpack.c.bf16 %v1276_v31, %v1275_v33 }
 0x106   :  { %v1042_v24 = vrot.slane %v750_v19, %v2058_v11 }
 0x107   :  { %v1077_v3 = vsel %vm362_vm2, %v1076_v7, %v1072_v32  ;;  %1533 = vmatprep.subr.bf16.mxu0 %v1532_v10 }
 0x108   :  { %v1043_v18 = vsel %vm369_vm3, %v1042_v24, %v2306_v20  ;;  %v792_v45 = vpop.xlane.xlu1 %791  ;;  %1535 = vmatpush3.bf16.msra.mxu0 %v1532_v10 }
 0x109   :  { %v789_v41 = vpop.xlane.xlu0 %788  ;;  %v1110_v28 = vrot.slane %v792_v45, %v2002_v44  ;;  %1537 = vmatprep.subr.bf16.mxu0 %v1536_v38 }
 0x10a   :  { %v1106_v25 = vrot.slane %v789_v41, %v1999_v49 }
 0x10c   :  { %v1111_v20 = vsel %vm355_vm1, %v1110_v28, %v1106_v25  ;;  %v180_v47 = vpop.xlane.xlu1 %179  ;;  %1539 = vmatpush3.bf16.msra.mxu0 %v1536_v38 }
 0x10d   :  { %v159_v32 = vpop.xlane.xlu0 %158  ;;  %v509_v36 = vrot.slane %v180_v47, %v2213_v59 }
 0x10e   :  { %v475_v17 = vrot.slane %v159_v32, %v2302_v29 }
 0x10f   :  { %v510_v57 = vsel %vm390_vm6, %v509_v36, %v505_v53 }
 0x110   :  { %v476_v30 = vsel %vm397_vm7, %v475_v17, %v2326_v48  ;;  %v222_v14 = vpop.xlane.xlu1 %221  ;;  %v1540_v48 = vpack.c.bf16 %v1280_v37, %v1279_v42 }
 0x111   :  { %v675_v13 = vsel %vm674_vm10, %v476_v30, %v2333_v27  ;;  %v201_v60 = vpop.xlane.xlu0 %200  ;;  %v577_v34 = vrot.slane %v222_v14, %v2076_v39 }
 0x112   :  { %v543_v56 = vrot.slane %v201_v60, %v2137_v1  ;;  %1541 = vmatprep.subr.bf16.mxu0 %v1540_v48 }
 0x113   :  { %v578_v53 = vsel %vm376_vm4, %v577_v34, %v573_v26  ;;  %1543 = vmatpush3.bf16.msra.mxu0 %v1540_v48  ;;  %v1544_v26 = vpack.c.bf16 %v1282_v0, %v1281_v6 }
 0x114   :  { %v544_v27 = vsel %vm383_vm5, %v543_v56, %v2342_v16  ;;  %v264_v43 = vpop.xlane.xlu1 %263 }
 0x115   :  { %v243_v46 = vpop.xlane.xlu0 %242  ;;  %v645_v50 = vrot.slane %v264_v43, %v2014_v21  ;;  %1545 = vmatprep.subr.bf16.mxu0 %v1544_v26 }
 0x116   :  { %v611_v54 = vrot.slane %v243_v46, %v2058_v11 }
 0x117   :  { %v646_v8 = vsel %vm362_vm2, %v645_v50, %v641_v40  ;;  %1547 = vmatpush3.bf16.msra.mxu0 %v1544_v26 }
 0x118   :  { %v612_v16 = vsel %vm369_vm3, %v611_v54, %v2354_v12  ;;  %v732_v55 = vpop.xlane.xlu1 %731 }
 0x119   :  { %v708_v5 = vpop.xlane.xlu0 %707  ;;  %v1013_v61 = vrot.slane %v732_v55, %v2137_v1 }
 0x11a   :  { %v974_v58 = vrot.slane %v708_v5, %v2137_v1 }
 0x11b   :  { %v1014_v52 = vsel %vm383_vm5, %v1013_v61, %v1009_v51 }
 0x11c   :  { %v975_v4 = vsel %vm383_vm5, %v974_v58, %v970_v62  ;;  %v774_v22 = vpop.xlane.xlu1 %773 }
 0x11d   :  { %v753_v15 = vpop.xlane.xlu0 %752  ;;  %v1081_v9 = vrot.slane %v774_v22, %v2058_v11 }
 0x11e   :  { %v1047_v40 = vrot.slane %v753_v15, %v2076_v39 }
 0x11f   :  { %v1082_v12 = vsel %vm369_vm3, %v1081_v9, %v1077_v3 }
 0x120   :  { %v1048_v35 = vsel %vm376_vm4, %v1047_v40, %v1043_v18  ;;  %v813_v19 = vpop.xlane.xlu1 %812 }
 0x121   :  { %v795_v7 = vpop.xlane.xlu0 %794  ;;  %v1145_v62 = vrot.slane %v813_v19, %v1999_v49 }
 0x122   :  { %v1115_v24 = vrot.slane %v795_v7, %v2014_v21 }
 0x124   :  { %v1116_v45 = vsel %vm362_vm2, %v1115_v24, %v1111_v20  ;;  %v183_v41 = vpop.xlane.xlu1 %182 }
 0x125   :  { %v816_v51 = vpop.xlane.xlu0 %815  ;;  %v514_v28 = vrot.slane %v183_v41, %v2302_v29 }
 0x126   :  { %v1149_v25 = vrot.slane %v816_v51, %v2002_v44 }
 0x127   :  { %v515_v33 = vsel %vm397_vm7, %v514_v28, %v510_v57 }
 0x128   :  { %v1150_v3 = vsel %vm355_vm1, %v1149_v25, %v1145_v62  ;;  %v677_v18 = vsel %vm676_vm11, %v515_v33, %v675_v13  ;;  %v225_v31 = vpop.xlane.xlu1 %224 }
 0x129   :  { %v204_v10 = vpop.xlane.xlu0 %203  ;;  %v582_v23 = vrot.slane %v225_v31, %v2137_v1 }
 0x12a   :  { %v548_v20 = vrot.slane %v204_v10, %v2213_v59 }
 0x12b   :  { %v583_v47 = vsel %vm383_vm5, %v582_v23, %v578_v53 }
 0x12c   :  { %v549_v32 = vsel %vm390_vm6, %v548_v20, %v544_v27  ;;  %v267_v36 = vpop.xlane.xlu1 %266 }
 0x12d   :  { %v246_v17 = vpop.xlane.xlu0 %245  ;;  %v650_v63 = vrot.slane %v267_v36, %v2058_v11 }
 0x12e   :  { %v616_v2 = vrot.slane %v246_v17, %v2076_v39 }
 0x12f   :  { %v2444_v38 = vsel %vm369_vm3, %v650_v63, %v646_v8 }
 0x130   :  { %v2447_v57 = vsel %vm376_vm4, %v616_v2, %v612_v16  ;;  %v735_v30 = vpop.xlane.xlu1 %734 }
 0x131   :  { %v711_v13 = vpop.xlane.xlu0 %710  ;;  %v1018_v14 = vrot.slane %v735_v30, %v2213_v59 }
 0x132   :  { %v979_v60 = vrot.slane %v711_v13, %v2213_v59 }
 0x133   :  { %v1019_v34 = vsel %vm390_vm6, %v1018_v14, %v1014_v52 }
 0x134   :  { %v980_v56 = vsel %vm390_vm6, %v979_v60, %v975_v4  ;;  %v777_v42 = vpop.xlane.xlu1 %776 }
 0x135   :  { %v756_v37 = vpop.xlane.xlu0 %755  ;;  %v1086_v48 = vrot.slane %v777_v42, %v2076_v39 }
 0x136   :  { %v1052_v53 = vrot.slane %v756_v37, %v2137_v1 }
 0x137   :  { %v2456_v27 = vsel %vm376_vm4, %v1086_v48, %v1082_v12 }
 0x138   :  { %v1053_v43 = vsel %vm383_vm5, %v1052_v53, %v1048_v35  ;;  %v819_v46 = vpop.xlane.xlu1 %818 }
 0x139   :  { %v798_v6 = vpop.xlane.xlu0 %797  ;;  %v1154_v0 = vrot.slane %v819_v46, %v2014_v21 }
 0x13a   :  { %v1120_v50 = vrot.slane %v798_v6, %v2058_v11 }
 0x13b   :  { %v2462_v54 = vsel %vm362_vm2, %v1154_v0, %v1150_v3 }
 0x13c   :  { %v2465_v26 = vsel %vm369_vm3, %v1120_v50, %v1116_v45  ;;  %v840_v8 = vpop.xlane.xlu1 %839 }
 0x13d   :  { %v837_v16 = vpop.xlane.xlu0 %836  ;;  %v1188_v55 = vrot.slane %v840_v8, %v2002_v44 }
 0x13e   :  { %v1184_v5 = vrot.slane %v837_v16, %v1999_v49 }
 0x140   :  { %v2470_v61 = vsel %vm355_vm1, %v1188_v55, %v1184_v5  ;;  %v228_v58 = vpop.xlane.xlu1 %227 }
 0x141   :  { %v207_v52 = vpop.xlane.xlu0 %206 }
 0x142   :  { %v553_v4 = vrot.slane %v207_v52, %v2302_v29 }
 0x144   :  { %v554_v22 = vsel %vm397_vm7, %v553_v4, %v549_v32  ;;  %v270_v9 = vpop.xlane.xlu1 %269 }
 0x145   :  { %v679_v15 = vsel %vm678_vm12, %v554_v22, %v677_v18  ;;  %v249_v40 = vpop.xlane.xlu0 %248  ;;  %v587_v18 = vrot.slane %v228_v58, %v2213_v59 }
 0x146   :  { %v621_v53 = vrot.slane %v249_v40, %v2137_v1 }
 0x147   :  { %v588_v20 = vsel %vm390_vm6, %v587_v18, %v583_v47 }
 0x148   :  { %v738_v12 = vpop.xlane.xlu1 %737  ;;  %v622_v50 = vsel %vm383_vm5, %v621_v53, %v2447_v57 }
 0x149   :  { %v714_v35 = vpop.xlane.xlu0 %713  ;;  %v1023_v19 = vrot.slane %v738_v12, %v2302_v29  ;;  %v655_v12 = vrot.slane %v270_v9, %v2076_v39 }
 0x14a   :  { %v984_v7 = vrot.slane %v714_v35, %v2302_v29 }
 0x14b   :  { %v1024_v24 = vsel %vm397_vm7, %v1023_v19, %v1019_v34 }
 0x14c   :  { %v985_v45 = vsel %vm397_vm7, %v984_v7, %v980_v56  ;;  %v780_v51 = vpop.xlane.xlu1 %779 }
 0x14d   :  { %v1259_v41 = vsel %vm672_vm8, %v1024_v24, %v985_v45  ;;  %v759_v62 = vpop.xlane.xlu0 %758 }
 0x14e   :  { %v1057_v2 = vrot.slane %v759_v62, %v2213_v59 }
 0x150   :  { %v2480_v28 = vpop.xlane.xlu1 %821  ;;  %v1058_v60 = vsel %vm390_vm6, %v1057_v2, %v1053_v43  ;;  %v1091_v43 = vrot.slane %v780_v51, %v2137_v1 }
 0x151   :  { %v801_v25 = vpop.xlane.xlu0 %800 }
 0x152   :  { %v1092_v22 = vsel %vm383_vm5, %v1091_v43, %v2456_v27  ;;  %v1125_v27 = vrot.slane %v801_v25, %v2076_v39 }
 0x154   :  { %v2482_v33 = vpop.xlane.xlu1 %860 }
 0x155   :  { %v2484_v3 = vpop.xlane.xlu0 %842 }
 0x158   :  { %v231_v31 = vpop.xlane.xlu1 %230 }
 0x159   :  { %v2487_v10 = vpop.xlane.xlu0 %863  ;;  %v592_v23 = vrot.slane %v231_v31, %v2302_v29 }
 0x15b   :  { %v593_v32 = vsel %vm397_vm7, %v592_v23, %v588_v20 }
 0x15c   :  { %v681_v36 = vsel %vm680_vm13, %v593_v32, %v679_v15  ;;  %v273_v17 = vpop.xlane.xlu1 %272  ;;  %v86_v32 = vld [vmem:[#allocation2] sm:$0xff] }
 0x15d   :  { %v252_v63 = vpop.xlane.xlu0 %251  ;;  %v660_v24 = vrot.slane %v273_v17, %v2137_v1 }
 0x15e   :  { %v626_v46 = vrot.slane %v252_v63, %v2213_v59 }
 0x160   :  { %v783_v30 = vpop.xlane.xlu1 %782  ;;  %v627_v16 = vsel %vm390_vm6, %v626_v46, %v622_v50 }
 0x161   :  { %v762_v13 = vpop.xlane.xlu0 %761  ;;  %v1096_v55 = vrot.slane %v783_v30, %v2213_v59 }
 0x162   :  { %v1062_v14 = vrot.slane %v762_v13, %v2302_v29 }
 0x163   :  { %v1097_v15 = vsel %vm390_vm6, %v1096_v55, %v1092_v22 }
 0x164   :  { %v1063_v34 = vsel %vm397_vm7, %v1062_v14, %v1058_v60  ;;  %v825_v42 = vpop.xlane.xlu1 %824  ;;  %v1159_v60 = vrot.slane %v2480_v28, %v2058_v11 }
 0x165   :  { %v1260_v56 = vsel %vm674_vm10, %v1063_v34, %v1259_v41  ;;  %v804_v47 = vpop.xlane.xlu0 %803  ;;  %v656_v41 = vsel %vm376_vm4, %v655_v12, %v2444_v38  ;;  %v1126_v38 = vsel %vm376_vm4, %v1125_v27, %v2465_v26  ;;  %v1164_v26 = vrot.slane %v825_v42, %v2076_v39 }
 0x166   :  { %v661_v18 = vsel %vm383_vm5, %v660_v24, %v656_v41  ;;  %v1130_v31 = vrot.slane %v804_v47, %v2137_v1  ;;  %v1160_v28 = vsel %vm369_vm3, %v1159_v60, %v2462_v54  ;;  %v1227_v54 = vrot.slane %v2487_v10, %v2002_v44 }
 0x167   :  { %v1165_v43 = vsel %vm376_vm4, %v1164_v26, %v1160_v28  ;;  %v1223_v12 = vrot.slane %v2482_v33, %v1999_v49 }
 0x168   :  { %v2498_v37 = vpop.xlane.xlu1 %866  ;;  %v1131_v2 = vsel %vm383_vm5, %v1130_v31, %v1126_v38 }
 0x169   :  { %v2500_v48 = vpop.xlane.xlu0 %845  ;;  %v1232_v22 = vrot.slane %v2498_v37, %v2014_v21  ;;  %v1228_v24 = vsel %vm355_vm1, %v1227_v54, %v1223_v12  ;;  %vm1379_vm1 = vcmask 31744  }
 0x16a   :  { %v1198_v50 = vrot.slane %v2500_v48, %v2058_v11 }
 0x16c   :  { %v276_v6 = vpop.xlane.xlu1 %275 }
 0x16d   :  { %v255_v0 = vpop.xlane.xlu0 %254  ;;  %v665_v45 = vrot.slane %v276_v6, %v2213_v59  ;;  %v1193_v6 = vrot.slane %v2484_v3, %v2014_v21 }
 0x16e   :  { %v631_v8 = vrot.slane %v255_v0, %v2302_v29 }
 0x16f   :  { %v666_v23 = vsel %vm390_vm6, %v665_v45, %v661_v18 }
 0x170   :  { %v632_v5 = vsel %vm397_vm7, %v631_v8, %v627_v16  ;;  %v807_v52 = vpop.xlane.xlu1 %806 }
 0x171   :  { %v683_v58 = vsel %vm682_vm14, %v632_v5, %v681_v36  ;;  %v786_v4 = vpop.xlane.xlu0 %785  ;;  %v1135_v20 = vrot.slane %v807_v52, %v2213_v59 }
 0x172   :  { %v1101_v57 = vrot.slane %v786_v4, %v2302_v29 }
 0x173   :  { %v1136_v14 = vsel %vm390_vm6, %v1135_v20, %v1131_v2 }
 0x174   :  { %v1102_v40 = vsel %vm397_vm7, %v1101_v57, %v1097_v15  ;;  %v849_v19 = vpop.xlane.xlu1 %848 }
 0x175   :  { %v1261_v35 = vsel %vm676_vm11, %v1102_v40, %v1260_v56  ;;  %v828_v7 = vpop.xlane.xlu0 %827  ;;  %v1203_v42 = vrot.slane %v849_v19, %v2076_v39 }
 0x176   :  { %v1169_v46 = vrot.slane %v828_v7, %v2137_v1 }
 0x178   :  { %v279_v51 = vpop.xlane.xlu1 %278  ;;  %v1170_v55 = vsel %vm383_vm5, %v1169_v46, %v1165_v43 }
 0x179   :  { %v870_v62 = vpop.xlane.xlu0 %869  ;;  %v670_v9 = vrot.slane %v279_v51, %v2302_v29 }
 0x17a   :  { %v1237_v44 = vrot.slane %v870_v62, %v2058_v11  ;;  %v1233_v11 = vsel %vm362_vm2, %v1232_v22, %v1228_v24 }
 0x17b   :  { %v671_v36 = vsel %vm397_vm7, %v670_v9, %v666_v23  ;;  %v690_v23 = vld [vmem:[#allocation3] sm:$0xff] }
 0x17c   :  { %v685_v25 = vsel %vm684_vm15, %v671_v36, %v683_v58  ;;  %v831_v17 = vpop.xlane.xlu1 %830  ;;  %v1194_v58 = vsel %vm362_vm2, %v1193_v6, %v2470_v61  ;;  %v1238_v41 = vsel %vm369_vm3, %v1237_v44, %v1233_v11 }
 0x17d   :  { %v810_v63 = vpop.xlane.xlu0 %809  ;;  %v687_v30 = vadd.f32 %v685_v25, %v86_v32  ;;  %v1174_v0 = vrot.slane %v831_v17, %v2213_v59  ;;  %v1199_v57 = vsel %vm369_vm3, %v1198_v50, %v1194_v58 }
 0x17e   :  { %v1140_v13 = vrot.slane %v810_v63, %v2302_v29  ;;  %v1204_v61 = vsel %vm376_vm4, %v1203_v42, %v1199_v57 }
 0x17f   :  { %689 = vst.msk [vmem:[#allocation2] sm:$0xff] %vm19_vm9, %v687_v30  ;;  %v1175_v48 = vsel %vm390_vm6, %v1174_v0, %v1170_v55 }
 0x180   :  { %v1141_v34 = vsel %vm397_vm7, %v1140_v13, %v1136_v14  ;;  %v873_v47 = vpop.xlane.xlu1 %872 }
 0x181   :  { %v1262_v56 = vsel %vm678_vm12, %v1141_v34, %v1261_v35  ;;  %v852_v53 = vpop.xlane.xlu0 %851  ;;  %v1242_v7 = vrot.slane %v873_v47, %v2076_v39 }
 0x182   :  { %v1208_v5 = vrot.slane %v852_v53, %v2137_v1 }
 0x183   :  { %v1243_v62 = vsel %vm376_vm4, %v1242_v7, %v1238_v41 }
 0x184   :  { %v855_v8 = vpop.xlane.xlu1 %854  ;;  %v1209_v21 = vsel %vm383_vm5, %v1208_v5, %v1204_v61 }
 0x185   :  { %v834_v16 = vpop.xlane.xlu0 %833  ;;  %v1213_v52 = vrot.slane %v855_v8, %v2213_v59 }
 0x186   :  { %v1179_v3 = vrot.slane %v834_v16, %v2302_v29  ;;  %v1272_v4 = vld [vmem:[#allocation2] sm:$0xff] }
 0x187   :  { %v1273_v40 = vmul.f32 0.0625, %v1272_v4  ;;  %v1214_v49 = vsel %vm390_vm6, %v1213_v52, %v1209_v21 }
 0x188   :  { %v1180_v15 = vsel %vm397_vm7, %v1179_v3, %v1175_v48  ;;  %v858_v35 = vpop.xlane.xlu1 %857 }
 0x189   :  { %v1263_v10 = vsel %vm680_vm13, %v1180_v15, %v1262_v56  ;;  %v876_v19 = vpop.xlane.xlu0 %875  ;;  %v1218_v37 = vrot.slane %v858_v35, %v2302_v29  ;;  %1524 = vmatprep.mubr.msk.f32.mxu0 %vm19_vm9, %v1273_v40 }
 0x18a   :  { %v1247_v33 = vrot.slane %v876_v19, %v2137_v1 }
 0x18b   :  { %v1219_v45 = vsel %vm397_vm7, %v1218_v37, %v1214_v49 }
 0x18c   :  { %v1264_v39 = vsel %vm682_vm14, %v1219_v45, %v1263_v10  ;;  %v882_v51 = vpop.xlane.xlu1 %881  ;;  %v1248_v9 = vsel %vm383_vm5, %v1247_v33, %v1243_v62 }
 0x18d   :  { %v879_v27 = vpop.xlane.xlu0 %878  ;;  %v1257_v31 = vrot.slane %v882_v51, %v2302_v29 }
 0x18e   :  { %v1252_v18 = vrot.slane %v879_v27, %v2213_v59  ;;  %v1283_v59 = vld [vmem:[%s2608_s2] sm:$0xf]  ;;  %s1589_s2 = smov [#allocation4]  }
 0x18f   :  { %1527 = vmatprep.subr.msk.mxu1 %vm1386_vm0, %v1283_v59  ;;  %s1479_s21 = sshll.u32 %s1589_s2, 4  ;;  %s1480_s21 = int_to_ptr.vmem [resolvable:$true] %s1479_s21 }
 0x190   :  { %v1253_v1 = vsel %vm390_vm6, %v1252_v18, %v1248_v9  ;;  %1528 = vmatpush3.msk.msra.mxu1 %vm1386_vm0, %v1283_v59  ;;  %s1563_s22 = scalar_lea.vmem %s1480_s21, 128  ;;  %p1568_p1 = scmp.lt.s32.totalorder %s1480_s21, %s1480_s21 }
 0x191   :  { %v1258_v20 = vsel %vm397_vm7, %v1257_v31, %v1253_v1  ;;  %p1564_p0 = scmp.ne.s32.totalorder %s1480_s21, %s1563_s22  ;;  %p1569_p2 = scmp.lt.s32.totalorder %s1563_s22, %s1563_s22 }
 0x192   :  { %v1265_v32 = vsel %vm684_vm15, %v1258_v20, %v1264_v39 }
 0x193   :  { %v1267_v36 = vmax.f32 %v690_v23, %v1265_v32  ;;  %p1570_p3 = por %p1569_p2, %p1568_p1 }
 0x195   :  { %1268 = vst.msk [vmem:[#allocation3] sm:$0xff] %vm19_vm9, %v1267_v36  ;;  %p1571_p4 = pnand %p1570_p3, %p1564_p0 }
 0x19c   :  { %v1274_v38 = vld [vmem:[#allocation3] sm:$0xff] }
 0x19d   :  { %1525 = vmatmul.mubr.msk.f32.vlgmr.msra.gmra.mrb[0].mxu0 %vm19_vm9, %v1274_v38 }
 0x270   :  { %v1526_v29 = vpop.f32.mrb[0].mxu0 }
 0x271   :  { %v1490_v25 = vmul.f32 -1.442695, %v1526_v29  ;;  %v1356_v17 = vpop.f32.mrb[1].mxu0 }
 0x272   :  { %v1489_v63 = vmul.f32 -1.442695, %v1356_v17 }
 0x273   :  { %1551 = vpow2.f32 %v1490_v25 }
 0x274   :  { %1553 = vpow2.f32 %v1489_v63 }
 0x27d   :  { %v1552_v2 = vpop.eup %1551 }
 0x27e   :  { %v1554_v30 = vpop.eup %1553  ;;  %v1372_v13 = vadd.f32 1.0, %v1552_v2 }
 0x27f   :  { %v1371_v14 = vadd.f32 1.0, %v1554_v30 }
 0x280   :  { %1555 = vrcp.f32 %v1372_v13 }
 0x281   :  { %1557 = vrcp.f32 %v1371_v14 }
 0x28a   :  { %v1556_v60 = vpop.eup %1555 }
 0x28b   :  { %v1558_v34 = vpop.eup %1557  ;;  %v1378_v56 = vmul.f32 %v1556_v60, %v1526_v29 }
 0x28c   :  { %v1377_v26 = vmul.f32 %v1558_v34, %v1356_v17 }
 0x28e   :  { %1529 = vmatprep.mubr.msk.f32.mxu1 %vm1379_vm1, %v1377_v26 }
 0x28f   :  { %1530 = vmatmul.mubr.msk.f32.vlgmr.msra.gmra.mrb[0].mxu1 %vm1379_vm1, %v1378_v56 }
 0x362   :  { %v1531_v47 = vpop.f32.mrb[0].mxu1 }
 0x363   :  { %v1456_v53 = vpop.f32.mrb[1].mxu1 }
 0x364   :  { %v1465_v46 = vadd.f32 %v1531_v47, %v1456_v53 }
 0x366   :  { %v1494_v6 = vmul.f32 -1.442695, %v1465_v46 }
 0x368   :  { %1559 = vpow2.f32 %v1494_v6 }
 0x372   :  { %v1560_v0 = vpop.eup %1559 }
 0x373   :  { %v1469_v28 = vadd.f32 1.0, %v1560_v0 }
 0x375   :  { %1561 = vrcp.f32 %v1469_v28 }
 0x37f   :  { %v1562_v50 = vpop.eup %1561 }
 0x380   :  { %1472 = vst.msk [vmem:[#allocation4] sm:$0xff] %vm19_vm9, %v1562_v50 }
 0x381   :  { %1574 = shalt.err (!%p1571_p4)
}
 0x382   :  { %s1575_s25 = scalar_lea.hbm %s2609_s3, 128 }
 0x383   :  { %p1576_p5 = scmp.ne.s32.totalorder %s2609_s3, %s1575_s25  ;;  %p1579_p6 = scmp.lt.u32.totalorder %s1575_s25, %s2609_s3 }
 0x385   :  { %p1581_p7 = pnand %p1579_p6, %p1576_p5 }
 0x387   :  { %1584 = shalt.err (!%p1581_p7)
}
 0x388   :  { %1482 = dma.vmem_to_hbm [thread:$0]  %s1480_s21, 128, %s2609_s3, [#allocation5]  }
 0x389   :  { %1585 = dma.done.wait [#allocation5], 128  }
 0x38a   :  { %1586 = vsyncadd [#allocation5], 4294967168 }
 0x38b   :  { %1486 = vsyncpa [#allocation5], 1 }

</bundles_post_ra>
